<compile_context>
chip_gen: v7x
topology: tpu7x:2x2x1
jax: 0.10.0
libtpu: 0.0.40
codegen_flags: <defaults>
</compile_context>

<pallas_src>
import jax
import jax.numpy as jnp
import numpy as np
from jax import lax
from jax.experimental import pallas as pl
from jax.experimental.pallas import tpu as pltpu


def _spectral_mul_kernel(xr_ref, xi_ref, wr_ref, ws_ref, wd_ref, or_ref, oi_ref):
    # xr_ref/xi_ref : (Cin, Bt, L)    wr/ws/wd      : (Cin, Ct, L)
    # or_ref/oi_ref : (Bt, Ct, L)
    # ws = wr + wi, wd = wi - wr (precomputed, weight-only).
    Cin, Bt, L = xr_ref.shape
    Ct = wr_ref.shape[1]

    def step(i, acc):
        acc_r, acc_i = acc
        xr = xr_ref[i][:, None, :]          # (Bt, 1, L)  leading-axis view
        xi = xi_ref[i][:, None, :]          # (Bt, 1, L)
        wr = wr_ref[i][None, :, :]          # (1, Ct, L)
        ws = ws_ref[i][None, :, :]
        wd = wd_ref[i][None, :, :]
        # Gauss 3-multiply complex product:
        #   out_r = xr*wr - xi*wi = k1 - k3
        #   out_i = xr*wi + xi*wr = k1 + k2
        k1 = wr * (xr + xi)
        k2 = xr * wd
        k3 = xi * ws
        return (acc_r + (k1 - k3), acc_i + (k1 + k2))

    acc_r = jnp.zeros((Bt, Ct, L), jnp.float32)
    acc_i = jnp.zeros((Bt, Ct, L), jnp.float32)
    if Cin <= 16:
        # Small, static channel count: full Python unroll.
        for i in range(Cin):
            acc_r, acc_i = step(i, (acc_r, acc_i))
    else:
        # Large channel count: keep code size / live ranges bounded.
        acc_r, acc_i = lax.fori_loop(0, Cin, step, (acc_r, acc_i), unroll=True)

    or_ref[...] = acc_r
    oi_ref[...] = acc_i


def _choose_tile(n, max_tile):
    """Largest tile <= max_tile that divides n and satisfies the sublane rule
    (multiple of 8, unless it is the full extent)."""
    if n <= max_tile:
        return n
    t = (max_tile // 8) * 8
    while t >= 8:
        if n % t == 0:
            return t
        t -= 8
    return n  # fall back to the full extent


def spectral_compl_mul(xr, xi, wr, ws, wd, *, max_b_tile=8, max_cout_tile=32):
    """Complex spectral contraction.

    xr/xi: (Cin, B, L) float32     wr/ws/wd: (Cin, Cout, L) float32
    returns out_r, out_i: (B, Cout, L) float32
    """
    Cin, B, L = xr.shape
    Cout = wr.shape[1]

    bt = _choose_tile(B, max_b_tile)
    ct = _choose_tile(Cout, max_cout_tile)
    nb, nc = B // bt, Cout // ct

    # grid = (cout tiles, B tiles): B is the fast axis, so the weight block index
    # is constant across consecutive steps and stays VMEM-resident.
    x_spec = pl.BlockSpec((Cin, bt, L), lambda c, b: (0, b, 0))
    w_spec = pl.BlockSpec((Cin, ct, L), lambda c, b: (0, c, 0))
    o_spec = pl.BlockSpec((bt, ct, L), lambda c, b: (b, c, 0))

    # Explicit VMEM budget from the actual (double-buffered) block footprint.
    block_bytes = 4 * (2 * Cin * bt * L + 3 * Cin * ct * L + 2 * bt * ct * L)
    vmem_limit = int(min(max(32 * 1024 * 1024, 3 * block_bytes),
                         100 * 1024 * 1024))

    out_r, out_i = pl.pallas_call(
        _spectral_mul_kernel,
        out_shape=(
            jax.ShapeDtypeStruct((B, Cout, L), jnp.float32),
            jax.ShapeDtypeStruct((B, Cout, L), jnp.float32),
        ),
        grid_spec=pltpu.PrefetchScalarGridSpec(
            num_scalar_prefetch=0,
            grid=(nc, nb),
            in_specs=[x_spec, x_spec, w_spec, w_spec, w_spec],
            out_specs=[o_spec, o_spec],
        ),
        compiler_params=pltpu.CompilerParams(
            dimension_semantics=("parallel", "parallel"),
            vmem_limit_bytes=vmem_limit,
        ),
    )(xr, xi, wr, ws, wd)
    return out_r, out_i


class SpectralConv2d:
    """JAX/Pallas port of the PyTorch SpectralConv2d (FNO spectral layer)."""

    def __init__(self, in_channels, out_channels, modes1, modes2, key):
        self.in_channels = in_channels
        self.out_channels = out_channels
        self.modes1 = modes1
        self.modes2 = modes2
        scale = 1.0 / (in_channels * out_channels)
        k1, k2, k3, k4 = jax.random.split(key, 4)
        shp = (in_channels, out_channels, modes1, modes2)
        # torch.rand(..., dtype=cfloat): real & imag each ~ U[0,1)
        self.w1_r = scale * jax.random.uniform(k1, shp, jnp.float32)
        self.w1_i = scale * jax.random.uniform(k2, shp, jnp.float32)
        self.w2_r = scale * jax.random.uniform(k3, shp, jnp.float32)
        self.w2_i = scale * jax.random.uniform(k4, shp, jnp.float32)

    def __call__(self, x):
        # x: (B, Cin, H, W) float32 (NCHW, same as PyTorch)
        B, Cin, H, W = x.shape
        m1, m2 = self.modes1, self.modes2
        assert 2 * m1 <= H, "modes1 too large: retained mode blocks overlap"
        assert m2 <= W // 2 + 1, "modes2 exceeds rfft width"
        M = m1 * m2
        Cout = self.out_channels

        x_ft = jnp.fft.rfft2(x)  # (B, Cin, H, W//2+1) complex64

        # Extract the two retained mode blocks and merge them along the lane
        # axis (lane width 2*M), then put the contraction dim Cin leading.
        blk0 = x_ft[:, :, :m1, :m2].reshape(B, Cin, M)
        blk1 = x_ft[:, :, H - m1:, :m2].reshape(B, Cin, M)
        x_modes = jnp.transpose(jnp.concatenate([blk0, blk1], axis=-1), (1, 0, 2))
        xr = jnp.real(x_modes).astype(jnp.float32)   # (Cin, B, 2M)
        xi = jnp.imag(x_modes).astype(jnp.float32)

        wr = jnp.concatenate(
            [self.w1_r.reshape(Cin, Cout, M), self.w2_r.reshape(Cin, Cout, M)],
            axis=-1)                                  # (Cin, Cout, 2M)
        wi = jnp.concatenate(
            [self.w1_i.reshape(Cin, Cout, M), self.w2_i.reshape(Cin, Cout, M)],
            axis=-1)
        # Gauss precompute (weight-only, once, in plain JAX).
        ws = wr + wi
        wd = wi - wr

        out_r, out_i = spectral_compl_mul(xr, xi, wr, ws, wd)  # (B, Cout, 2M)
        out_c = (out_r + 1j * out_i).astype(jnp.complex64)

        out_ft = jnp.zeros((B, Cout, H, W // 2 + 1), jnp.complex64)
        out_ft = out_ft.at[:, :, :m1, :m2].set(
            out_c[..., :M].reshape(B, Cout, m1, m2))
        out_ft = out_ft.at[:, :, H - m1:, :m2].set(
            out_c[..., M:].reshape(B, Cout, m1, m2))

        return jnp.fft.irfft2(out_ft, s=(H, W))  # (B, Cout, H, W) float32


def _reference(x, layer):
    """Pure-JAX reference matching the PyTorch forward."""
    B, Cin, H, W = x.shape
    m1, m2 = layer.modes1, layer.modes2
    Cout = layer.out_channels
    x_ft = jnp.fft.rfft2(x)
    w1 = (layer.w1_r + 1j * layer.w1_i).astype(jnp.complex64)
    w2 = (layer.w2_r + 1j * layer.w2_i).astype(jnp.complex64)
    out_ft = jnp.zeros((B, Cout, H, W // 2 + 1), jnp.complex64)
    out_ft = out_ft.at[:, :, :m1, :m2].set(
        jnp.einsum('bixy,ioxy->boxy', x_ft[:, :, :m1, :m2], w1)
    )
    out_ft = out_ft.at[:, :, H - m1:, :m2].set(
        jnp.einsum('bixy,ioxy->boxy', x_ft[:, :, H - m1:, :m2], w2)
    )
    return jnp.fft.irfft2(out_ft, s=(H, W))


if __name__ == "__main__":
    key = jax.random.PRNGKey(0)
    k_w, k_x = jax.random.split(key)

    B, Cin, Cout, H, W = 2, 4, 4, 16, 16
    modes1, modes2 = 8, 8

    layer = SpectralConv2d(Cin, Cout, modes1, modes2, k_w)
    x = jax.random.normal(k_x, (B, Cin, H, W), jnp.float32)

    out = layer(x)
    out = jax.block_until_ready(out)

    ref = jax.block_until_ready(_reference(x, layer))
    assert out.shape == (B, Cout, H, W)
    assert np.allclose(np.asarray(out), np.asarray(ref), atol=1e-4, rtol=1e-4)

    print("KERNEL_OK")
</pallas_src>

<mosaic_0001>
module attributes {stable_mosaic.version = 11 : i64} {
  func.func @_spectral_mul_kernel(%arg0: i32, %arg1: i32, %arg2: memref<4x2x128xf32, #tpu.memory_space<vmem>>, %arg3: memref<4x2x128xf32, #tpu.memory_space<vmem>>, %arg4: memref<4x4x128xf32, #tpu.memory_space<vmem>>, %arg5: memref<4x4x128xf32, #tpu.memory_space<vmem>>, %arg6: memref<4x4x128xf32, #tpu.memory_space<vmem>>, %arg7: memref<2x4x128xf32, #tpu.memory_space<vmem>>, %arg8: memref<2x4x128xf32, #tpu.memory_space<vmem>>) attributes {dimension_semantics = [#tpu.dimension_semantics<parallel>, #tpu.dimension_semantics<parallel>], iteration_bounds = array<i64: 1, 1>, scalar_prefetch = 0 : i64, scratch_operands = 0 : i64, tpu.core_type = #tpu.core_type<tc>, window_params = [{transform_indices = @transform_0, window_bounds = array<i64: 4, 2, 128>}, {transform_indices = @transform_1, window_bounds = array<i64: 4, 2, 128>}, {transform_indices = @transform_2, window_bounds = array<i64: 4, 4, 128>}, {transform_indices = @transform_3, window_bounds = array<i64: 4, 4, 128>}, {transform_indices = @transform_4, window_bounds = array<i64: 4, 4, 128>}, {transform_indices = @transform_5, window_bounds = array<i64: 2, 4, 128>}, {transform_indices = @transform_6, window_bounds = array<i64: 2, 4, 128>}]} {
    %cst = arith.constant 0.000000e+00 : f32
    %0 = vector.broadcast %cst : f32 to vector<2x4x128xf32>
    %cst_0 = arith.constant 0.000000e+00 : f32
    %1 = vector.broadcast %cst_0 : f32 to vector<2x4x128xf32>
    %c0 = arith.constant 0 : index
    %c0_1 = arith.constant 0 : index
    %c0_2 = arith.constant 0 : index
    %2 = vector.load %arg2[%c0, %c0_1, %c0_2] : memref<4x2x128xf32, #tpu.memory_space<vmem>>, vector<1x2x128xf32>
    %3 = vector.shape_cast %2 : vector<1x2x128xf32> to vector<2x128xf32>
    %4 = vector.shape_cast %3 : vector<2x128xf32> to vector<2x1x128xf32>
    %c0_3 = arith.constant 0 : index
    %c0_4 = arith.constant 0 : index
    %c0_5 = arith.constant 0 : index
    %5 = vector.load %arg3[%c0_3, %c0_4, %c0_5] : memref<4x2x128xf32, #tpu.memory_space<vmem>>, vector<1x2x128xf32>
    %6 = vector.shape_cast %5 : vector<1x2x128xf32> to vector<2x128xf32>
    %7 = vector.shape_cast %6 : vector<2x128xf32> to vector<2x1x128xf32>
    %c0_6 = arith.constant 0 : index
    %c0_7 = arith.constant 0 : index
    %c0_8 = arith.constant 0 : index
    %8 = vector.load %arg4[%c0_6, %c0_7, %c0_8] : memref<4x4x128xf32, #tpu.memory_space<vmem>>, vector<1x4x128xf32>
    %9 = vector.shape_cast %8 : vector<1x4x128xf32> to vector<4x128xf32>
    %10 = vector.shape_cast %9 : vector<4x128xf32> to vector<1x4x128xf32>
    %c0_9 = arith.constant 0 : index
    %c0_10 = arith.constant 0 : index
    %c0_11 = arith.constant 0 : index
    %11 = vector.load %arg5[%c0_9, %c0_10, %c0_11] : memref<4x4x128xf32, #tpu.memory_space<vmem>>, vector<1x4x128xf32>
    %12 = vector.shape_cast %11 : vector<1x4x128xf32> to vector<4x128xf32>
    %13 = vector.shape_cast %12 : vector<4x128xf32> to vector<1x4x128xf32>
    %c0_12 = arith.constant 0 : index
    %c0_13 = arith.constant 0 : index
    %c0_14 = arith.constant 0 : index
    %14 = vector.load %arg6[%c0_12, %c0_13, %c0_14] : memref<4x4x128xf32, #tpu.memory_space<vmem>>, vector<1x4x128xf32>
    %15 = vector.shape_cast %14 : vector<1x4x128xf32> to vector<4x128xf32>
    %16 = vector.shape_cast %15 : vector<4x128xf32> to vector<1x4x128xf32>
    %17 = arith.addf %4, %7 : vector<2x1x128xf32>
    %18 = vector.broadcast %10 : vector<1x4x128xf32> to vector<2x4x128xf32>
    %19 = vector.broadcast %17 : vector<2x1x128xf32> to vector<2x4x128xf32>
    %20 = arith.mulf %18, %19 : vector<2x4x128xf32>
    %21 = vector.broadcast %4 : vector<2x1x128xf32> to vector<2x4x128xf32>
    %22 = vector.broadcast %16 : vector<1x4x128xf32> to vector<2x4x128xf32>
    %23 = arith.mulf %21, %22 : vector<2x4x128xf32>
    %24 = vector.broadcast %7 : vector<2x1x128xf32> to vector<2x4x128xf32>
    %25 = vector.broadcast %13 : vector<1x4x128xf32> to vector<2x4x128xf32>
    %26 = arith.mulf %24, %25 : vector<2x4x128xf32>
    %27 = arith.subf %20, %26 : vector<2x4x128xf32>
    %28 = arith.addf %0, %27 : vector<2x4x128xf32>
    %29 = arith.addf %20, %23 : vector<2x4x128xf32>
    %30 = arith.addf %1, %29 : vector<2x4x128xf32>
    %c1 = arith.constant 1 : index
    %c0_15 = arith.constant 0 : index
    %c0_16 = arith.constant 0 : index
    %31 = vector.load %arg2[%c1, %c0_15, %c0_16] : memref<4x2x128xf32, #tpu.memory_space<vmem>>, vector<1x2x128xf32>
    %32 = vector.shape_cast %31 : vector<1x2x128xf32> to vector<2x128xf32>
    %33 = vector.shape_cast %32 : vector<2x128xf32> to vector<2x1x128xf32>
    %c1_17 = arith.constant 1 : index
    %c0_18 = arith.constant 0 : index
    %c0_19 = arith.constant 0 : index
    %34 = vector.load %arg3[%c1_17, %c0_18, %c0_19] : memref<4x2x128xf32, #tpu.memory_space<vmem>>, vector<1x2x128xf32>
    %35 = vector.shape_cast %34 : vector<1x2x128xf32> to vector<2x128xf32>
    %36 = vector.shape_cast %35 : vector<2x128xf32> to vector<2x1x128xf32>
    %c1_20 = arith.constant 1 : index
    %c0_21 = arith.constant 0 : index
    %c0_22 = arith.constant 0 : index
    %37 = vector.load %arg4[%c1_20, %c0_21, %c0_22] : memref<4x4x128xf32, #tpu.memory_space<vmem>>, vector<1x4x128xf32>
    %38 = vector.shape_cast %37 : vector<1x4x128xf32> to vector<4x128xf32>
    %39 = vector.shape_cast %38 : vector<4x128xf32> to vector<1x4x128xf32>
    %c1_23 = arith.constant 1 : index
    %c0_24 = arith.constant 0 : index
    %c0_25 = arith.constant 0 : index
    %40 = vector.load %arg5[%c1_23, %c0_24, %c0_25] : memref<4x4x128xf32, #tpu.memory_space<vmem>>, vector<1x4x128xf32>
    %41 = vector.shape_cast %40 : vector<1x4x128xf32> to vector<4x128xf32>
    %42 = vector.shape_cast %41 : vector<4x128xf32> to vector<1x4x128xf32>
    %c1_26 = arith.constant 1 : index
    %c0_27 = arith.constant 0 : index
    %c0_28 = arith.constant 0 : index
    %43 = vector.load %arg6[%c1_26, %c0_27, %c0_28] : memref<4x4x128xf32, #tpu.memory_space<vmem>>, vector<1x4x128xf32>
    %44 = vector.shape_cast %43 : vector<1x4x128xf32> to vector<4x128xf32>
    %45 = vector.shape_cast %44 : vector<4x128xf32> to vector<1x4x128xf32>
    %46 = arith.addf %33, %36 : vector<2x1x128xf32>
    %47 = vector.broadcast %39 : vector<1x4x128xf32> to vector<2x4x128xf32>
    %48 = vector.broadcast %46 : vector<2x1x128xf32> to vector<2x4x128xf32>
    %49 = arith.mulf %47, %48 : vector<2x4x128xf32>
    %50 = vector.broadcast %33 : vector<2x1x128xf32> to vector<2x4x128xf32>
    %51 = vector.broadcast %45 : vector<1x4x128xf32> to vector<2x4x128xf32>
    %52 = arith.mulf %50, %51 : vector<2x4x128xf32>
    %53 = vector.broadcast %36 : vector<2x1x128xf32> to vector<2x4x128xf32>
    %54 = vector.broadcast %42 : vector<1x4x128xf32> to vector<2x4x128xf32>
    %55 = arith.mulf %53, %54 : vector<2x4x128xf32>
    %56 = arith.subf %49, %55 : vector<2x4x128xf32>
    %57 = arith.addf %28, %56 : vector<2x4x128xf32>
    %58 = arith.addf %49, %52 : vector<2x4x128xf32>
    %59 = arith.addf %30, %58 : vector<2x4x128xf32>
    %c2 = arith.constant 2 : index
    %c0_29 = arith.constant 0 : index
    %c0_30 = arith.constant 0 : index
    %60 = vector.load %arg2[%c2, %c0_29, %c0_30] : memref<4x2x128xf32, #tpu.memory_space<vmem>>, vector<1x2x128xf32>
    %61 = vector.shape_cast %60 : vector<1x2x128xf32> to vector<2x128xf32>
    %62 = vector.shape_cast %61 : vector<2x128xf32> to vector<2x1x128xf32>
    %c2_31 = arith.constant 2 : index
    %c0_32 = arith.constant 0 : index
    %c0_33 = arith.constant 0 : index
    %63 = vector.load %arg3[%c2_31, %c0_32, %c0_33] : memref<4x2x128xf32, #tpu.memory_space<vmem>>, vector<1x2x128xf32>
    %64 = vector.shape_cast %63 : vector<1x2x128xf32> to vector<2x128xf32>
    %65 = vector.shape_cast %64 : vector<2x128xf32> to vector<2x1x128xf32>
    %c2_34 = arith.constant 2 : index
    %c0_35 = arith.constant 0 : index
    %c0_36 = arith.constant 0 : index
    %66 = vector.load %arg4[%c2_34, %c0_35, %c0_36] : memref<4x4x128xf32, #tpu.memory_space<vmem>>, vector<1x4x128xf32>
    %67 = vector.shape_cast %66 : vector<1x4x128xf32> to vector<4x128xf32>
    %68 = vector.shape_cast %67 : vector<4x128xf32> to vector<1x4x128xf32>
    %c2_37 = arith.constant 2 : index
    %c0_38 = arith.constant 0 : index
    %c0_39 = arith.constant 0 : index
    %69 = vector.load %arg5[%c2_37, %c0_38, %c0_39] : memref<4x4x128xf32, #tpu.memory_space<vmem>>, vector<1x4x128xf32>
    %70 = vector.shape_cast %69 : vector<1x4x128xf32> to vector<4x128xf32>
    %71 = vector.shape_cast %70 : vector<4x128xf32> to vector<1x4x128xf32>
    %c2_40 = arith.constant 2 : index
    %c0_41 = arith.constant 0 : index
    %c0_42 = arith.constant 0 : index
    %72 = vector.load %arg6[%c2_40, %c0_41, %c0_42] : memref<4x4x128xf32, #tpu.memory_space<vmem>>, vector<1x4x128xf32>
    %73 = vector.shape_cast %72 : vector<1x4x128xf32> to vector<4x128xf32>
    %74 = vector.shape_cast %73 : vector<4x128xf32> to vector<1x4x128xf32>
    %75 = arith.addf %62, %65 : vector<2x1x128xf32>
    %76 = vector.broadcast %68 : vector<1x4x128xf32> to vector<2x4x128xf32>
    %77 = vector.broadcast %75 : vector<2x1x128xf32> to vector<2x4x128xf32>
    %78 = arith.mulf %76, %77 : vector<2x4x128xf32>
    %79 = vector.broadcast %62 : vector<2x1x128xf32> to vector<2x4x128xf32>
    %80 = vector.broadcast %74 : vector<1x4x128xf32> to vector<2x4x128xf32>
    %81 = arith.mulf %79, %80 : vector<2x4x128xf32>
    %82 = vector.broadcast %65 : vector<2x1x128xf32> to vector<2x4x128xf32>
    %83 = vector.broadcast %71 : vector<1x4x128xf32> to vector<2x4x128xf32>
    %84 = arith.mulf %82, %83 : vector<2x4x128xf32>
    %85 = arith.subf %78, %84 : vector<2x4x128xf32>
    %86 = arith.addf %57, %85 : vector<2x4x128xf32>
    %87 = arith.addf %78, %81 : vector<2x4x128xf32>
    %88 = arith.addf %59, %87 : vector<2x4x128xf32>
    %c3 = arith.constant 3 : index
    %c0_43 = arith.constant 0 : index
    %c0_44 = arith.constant 0 : index
    %89 = vector.load %arg2[%c3, %c0_43, %c0_44] : memref<4x2x128xf32, #tpu.memory_space<vmem>>, vector<1x2x128xf32>
    %90 = vector.shape_cast %89 : vector<1x2x128xf32> to vector<2x128xf32>
    %91 = vector.shape_cast %90 : vector<2x128xf32> to vector<2x1x128xf32>
    %c3_45 = arith.constant 3 : index
    %c0_46 = arith.constant 0 : index
    %c0_47 = arith.constant 0 : index
    %92 = vector.load %arg3[%c3_45, %c0_46, %c0_47] : memref<4x2x128xf32, #tpu.memory_space<vmem>>, vector<1x2x128xf32>
    %93 = vector.shape_cast %92 : vector<1x2x128xf32> to vector<2x128xf32>
    %94 = vector.shape_cast %93 : vector<2x128xf32> to vector<2x1x128xf32>
    %c3_48 = arith.constant 3 : index
    %c0_49 = arith.constant 0 : index
    %c0_50 = arith.constant 0 : index
    %95 = vector.load %arg4[%c3_48, %c0_49, %c0_50] : memref<4x4x128xf32, #tpu.memory_space<vmem>>, vector<1x4x128xf32>
    %96 = vector.shape_cast %95 : vector<1x4x128xf32> to vector<4x128xf32>
    %97 = vector.shape_cast %96 : vector<4x128xf32> to vector<1x4x128xf32>
    %c3_51 = arith.constant 3 : index
    %c0_52 = arith.constant 0 : index
    %c0_53 = arith.constant 0 : index
    %98 = vector.load %arg5[%c3_51, %c0_52, %c0_53] : memref<4x4x128xf32, #tpu.memory_space<vmem>>, vector<1x4x128xf32>
    %99 = vector.shape_cast %98 : vector<1x4x128xf32> to vector<4x128xf32>
    %100 = vector.shape_cast %99 : vector<4x128xf32> to vector<1x4x128xf32>
    %c3_54 = arith.constant 3 : index
    %c0_55 = arith.constant 0 : index
    %c0_56 = arith.constant 0 : index
    %101 = vector.load %arg6[%c3_54, %c0_55, %c0_56] : memref<4x4x128xf32, #tpu.memory_space<vmem>>, vector<1x4x128xf32>
    %102 = vector.shape_cast %101 : vector<1x4x128xf32> to vector<4x128xf32>
    %103 = vector.shape_cast %102 : vector<4x128xf32> to vector<1x4x128xf32>
    %104 = arith.addf %91, %94 : vector<2x1x128xf32>
    %105 = vector.broadcast %97 : vector<1x4x128xf32> to vector<2x4x128xf32>
    %106 = vector.broadcast %104 : vector<2x1x128xf32> to vector<2x4x128xf32>
    %107 = arith.mulf %105, %106 : vector<2x4x128xf32>
    %108 = vector.broadcast %91 : vector<2x1x128xf32> to vector<2x4x128xf32>
    %109 = vector.broadcast %103 : vector<1x4x128xf32> to vector<2x4x128xf32>
    %110 = arith.mulf %108, %109 : vector<2x4x128xf32>
    %111 = vector.broadcast %94 : vector<2x1x128xf32> to vector<2x4x128xf32>
    %112 = vector.broadcast %100 : vector<1x4x128xf32> to vector<2x4x128xf32>
    %113 = arith.mulf %111, %112 : vector<2x4x128xf32>
    %114 = arith.subf %107, %113 : vector<2x4x128xf32>
    %115 = arith.addf %86, %114 : vector<2x4x128xf32>
    %116 = arith.addf %107, %110 : vector<2x4x128xf32>
    %117 = arith.addf %88, %116 : vector<2x4x128xf32>
    %c0_57 = arith.constant 0 : index
    %c0_58 = arith.constant 0 : index
    %c0_59 = arith.constant 0 : index
    %118 = vector.load %arg7[%c0_57, %c0_58, %c0_59] : memref<2x4x128xf32, #tpu.memory_space<vmem>>, vector<2x4x128xf32>
    tpu.vector_store %arg7[%c0_57, %c0_58, %c0_59], %115 {strides = array<i32>} : memref<2x4x128xf32, #tpu.memory_space<vmem>>, vector<2x4x128xf32>,
    %c0_60 = arith.constant 0 : index
    %c0_61 = arith.constant 0 : index
    %c0_62 = arith.constant 0 : index
    %119 = vector.load %arg8[%c0_60, %c0_61, %c0_62] : memref<2x4x128xf32, #tpu.memory_space<vmem>>, vector<2x4x128xf32>
    tpu.vector_store %arg8[%c0_60, %c0_61, %c0_62], %117 {strides = array<i32>} : memref<2x4x128xf32, #tpu.memory_space<vmem>>, vector<2x4x128xf32>,
    return
  }
  func.func @transform_0(%arg0: i32, %arg1: i32) -> (i32, i32, i32) {
    %c0_i32 = arith.constant 0 : i32
    %c0_i32_0 = arith.constant 0 : i32
    %c0_i32_1 = arith.constant 0 : i32
    return %c0_i32, %arg1, %c0_i32_0 : i32, i32, i32
  }
  func.func @transform_1(%arg0: i32, %arg1: i32) -> (i32, i32, i32) {
    %c0_i32 = arith.constant 0 : i32
    %c0_i32_0 = arith.constant 0 : i32
    %c0_i32_1 = arith.constant 0 : i32
    return %c0_i32, %arg1, %c0_i32_0 : i32, i32, i32
  }
  func.func @transform_2(%arg0: i32, %arg1: i32) -> (i32, i32, i32) {
    %c0_i32 = arith.constant 0 : i32
    %c0_i32_0 = arith.constant 0 : i32
    %c0_i32_1 = arith.constant 0 : i32
    return %c0_i32, %arg0, %c0_i32_0 : i32, i32, i32
  }
  func.func @transform_3(%arg0: i32, %arg1: i32) -> (i32, i32, i32) {
    %c0_i32 = arith.constant 0 : i32
    %c0_i32_0 = arith.constant 0 : i32
    %c0_i32_1 = arith.constant 0 : i32
    return %c0_i32, %arg0, %c0_i32_0 : i32, i32, i32
  }
  func.func @transform_4(%arg0: i32, %arg1: i32) -> (i32, i32, i32) {
    %c0_i32 = arith.constant 0 : i32
    %c0_i32_0 = arith.constant 0 : i32
    %c0_i32_1 = arith.constant 0 : i32
    return %c0_i32, %arg0, %c0_i32_0 : i32, i32, i32
  }
  func.func @transform_5(%arg0: i32, %arg1: i32) -> (i32, i32, i32) {
    %c0_i32 = arith.constant 0 : i32
    %c0_i32_0 = arith.constant 0 : i32
    return %arg1, %arg0, %c0_i32 : i32, i32, i32
  }
  func.func @transform_6(%arg0: i32, %arg1: i32) -> (i32, i32, i32) {
    %c0_i32 = arith.constant 0 : i32
    %c0_i32_0 = arith.constant 0 : i32
    return %arg1, %arg0, %c0_i32 : i32, i32, i32
  }
}

</mosaic_0001>

<bundles_post_ra>
// kernel: tpu_custom_call.1
= control target key start
LH: loop header
LB: loop body
LE: loop exit
PB: predicated region body
PF: predicated region fallthrough
CT: control target
= control target key end

     0   :  { %12 = vsyncpa [#allocation3], 0  ;;  %s969_s0 = inlined_call_operand.hbm [shape: f32[4,2,128], index: 0, kind: input, shape index: {}]   ;;  %s970_s1 = inlined_call_operand.hbm [shape: f32[4,2,128], index: 1, kind: input, shape index: {}]   ;;  %s971_s2 = inlined_call_operand.hbm [shape: f32[4,4,128], index: 2, kind: input, shape index: {}]   ;;  %s972_s3 = inlined_call_operand.hbm [shape: f32[4,4,128], index: 3, kind: input, shape index: {}]   ;;  %s973_s4 = inlined_call_operand.hbm [shape: f32[4,4,128], index: 4, kind: input, shape index: {}]   ;;  %s974_s5 = inlined_call_operand.hbm [shape: f32[2,4,128], index: 5, kind: output, shape index: {0}]   ;;  %s975_s6 = inlined_call_operand.hbm [shape: f32[2,4,128], index: 6, kind: output, shape index: {1}]  }
   0x1   :  { %13 = vsyncpa [#allocation6], 0 }
   0x2   :  { %14 = vsyncpa [#allocation9], 0 }
   0x3   :  { %15 = vsyncpa [#allocation4], 0 }
   0x4   :  { %16 = vsyncpa [#allocation13], 0  ;;  %s742_s21 = smov [#allocation5]   ;;  %s578_s25 = scalar_lea.hbm %s970_s1, 128 }
   0x5   :  { %s34_s22 = sshll.u32 %s742_s21, 4  ;;  %p579_p0 = scmp.ne.s32.totalorder %s970_s1, %s578_s25  ;;  %s35_s22 = int_to_ptr.vmem [resolvable:$true] %s34_s22 }
   0x6   :  { %p582_p1 = scmp.lt.u32.totalorder %s578_s25, %s970_s1 }
   0x8   :  { %p584_p2 = pnand %p582_p1, %p579_p0 }
   0xa   :  { %587 = shalt.err (!%p584_p2)
}
   0xb   :  { %s588_s30 = scalar_lea.vmem %s35_s22, 128  ;;  %p593_p4 = scmp.lt.s32.totalorder %s35_s22, %s35_s22 }
   0xc   :  { %p589_p3 = scmp.ne.s32.totalorder %s35_s22, %s588_s30  ;;  %p594_p5 = scmp.lt.s32.totalorder %s588_s30, %s588_s30 }
   0xe   :  { %p595_p6 = por %p594_p5, %p593_p4 }
  0x10   :  { %p596_p7 = pnand %p595_p6, %p589_p3 }
  0x12   :  { %599 = shalt.err (!%p596_p7)
}
  0x13   :  { %s743_s7 = smov 32   ;;  %s744_s8 = smov 2  }
  0x14   :  { %40 = dma.hbm_to_vmem [thread:$0]  %s970_s1, 128, %s35_s22, [#allocation6], %s743_s7, %s743_s7, %s744_s8  }
  0x15   :  { %s745_s11 = smov [#allocation8]   ;;  %s746_s13 = smov [#allocation2]  }
  0x16   :  { %s58_s12 = sshll.u32 %s745_s11, 4  ;;  %s22_s14 = sshll.u32 %s746_s13, 4  ;;  %s59_s12 = int_to_ptr.vmem [resolvable:$true] %s58_s12  ;;  %s23_s14 = int_to_ptr.vmem [resolvable:$true] %s22_s14 }
  0x17   :  { %s600_s17 = scalar_lea.hbm %s972_s3, 256 }
  0x18   :  { %p601_p8 = scmp.ne.s32.totalorder %s972_s3, %s600_s17  ;;  %p604_p9 = scmp.lt.u32.totalorder %s600_s17, %s972_s3 }
  0x1a   :  { %p606_p10 = pnand %p604_p9, %p601_p8 }
  0x1c   :  { %609 = shalt.err (!%p606_p10)
}
  0x1d   :  { %s610_s1 = scalar_lea.vmem %s59_s12, 256  ;;  %p615_p12 = scmp.lt.s32.totalorder %s59_s12, %s59_s12 }
  0x1e   :  { %p611_p11 = scmp.ne.s32.totalorder %s59_s12, %s610_s1  ;;  %p616_p13 = scmp.lt.s32.totalorder %s610_s1, %s610_s1 }
  0x20   :  { %p617_p0 = por %p616_p13, %p615_p12 }
  0x22   :  { %p618_p1 = pnand %p617_p0, %p611_p11 }
  0x24   :  { %621 = shalt.err (!%p618_p1)
}
  0x25   :  { %s747_s22 = smov 64   ;;  %s748_s23 = smov 4  }
  0x26   :  { %64 = dma.hbm_to_vmem [thread:$0]  %s972_s3, 256, %s59_s12, [#allocation9], %s747_s22, %s747_s22, %s748_s23  }
  0x27   :  { %s622_s28 = scalar_lea.hbm %s969_s0, 128 }
  0x28   :  { %p623_p2 = scmp.ne.s32.totalorder %s969_s0, %s622_s28  ;;  %p626_p3 = scmp.lt.u32.totalorder %s622_s28, %s969_s0 }
  0x2a   :  { %p628_p4 = pnand %p626_p3, %p623_p2 }
  0x2c   :  { %631 = shalt.err (!%p628_p4)
}
  0x2d   :  { %s632_s11 = scalar_lea.vmem %s23_s14, 128  ;;  %p637_p6 = scmp.lt.s32.totalorder %s23_s14, %s23_s14 }
  0x2e   :  { %p633_p5 = scmp.ne.s32.totalorder %s23_s14, %s632_s11  ;;  %p638_p7 = scmp.lt.s32.totalorder %s632_s11, %s632_s11 }
  0x30   :  { %p639_p8 = por %p638_p7, %p637_p6 }
  0x32   :  { %p640_p9 = pnand %p639_p8, %p633_p5 }
  0x34   :  { %643 = shalt.err (!%p640_p9)
}
  0x35   :  { %28 = dma.hbm_to_vmem [thread:$0]  %s969_s0, 128, %s23_s14, [#allocation3], %s743_s7, %s743_s7, %s744_s8  }
  0x36   :  { %s749_s13 = smov [#allocation7]   ;;  %s750_s16 = smov [#allocation10]  }
  0x37   :  { %s46_s15 = sshll.u32 %s749_s13, 4  ;;  %s70_s17 = sshll.u32 %s750_s16, 4  ;;  %s47_s15 = int_to_ptr.vmem [resolvable:$true] %s46_s15  ;;  %s71_s17 = int_to_ptr.vmem [resolvable:$true] %s70_s17 }
  0x38   :  { %s644_s20 = scalar_lea.hbm %s971_s2, 256 }
  0x39   :  { %p645_p10 = scmp.ne.s32.totalorder %s971_s2, %s644_s20  ;;  %p648_p11 = scmp.lt.u32.totalorder %s644_s20, %s971_s2 }
  0x3b   :  { %p650_p12 = pnand %p648_p11, %p645_p10 }
  0x3d   :  { %653 = shalt.err (!%p650_p12)
}
  0x3e   :  { %s654_s0 = scalar_lea.vmem %s47_s15, 256  ;;  %p659_p0 = scmp.lt.s32.totalorder %s47_s15, %s47_s15 }
  0x3f   :  { %p655_p13 = scmp.ne.s32.totalorder %s47_s15, %s654_s0  ;;  %p660_p1 = scmp.lt.s32.totalorder %s654_s0, %s654_s0 }
  0x41   :  { %p661_p2 = por %p660_p1, %p659_p0 }
  0x43   :  { %p662_p3 = pnand %p661_p2, %p655_p13 }
  0x45   :  { %665 = shalt.err (!%p662_p3)
}
  0x46   :  { %52 = dma.hbm_to_vmem [thread:$0]  %s971_s2, 256, %s47_s15, [#allocation6], %s747_s22, %s747_s22, %s748_s23  }
  0x47   :  { %s666_s27 = scalar_lea.hbm %s973_s4, 256 }
  0x48   :  { %p667_p4 = scmp.ne.s32.totalorder %s973_s4, %s666_s27  ;;  %p670_p5 = scmp.lt.u32.totalorder %s666_s27, %s973_s4 }
  0x4a   :  { %p672_p6 = pnand %p670_p5, %p667_p4 }
  0x4c   :  { %675 = shalt.err (!%p672_p6)
}
  0x4d   :  { %s676_s10 = scalar_lea.vmem %s71_s17, 256  ;;  %p681_p8 = scmp.lt.s32.totalorder %s71_s17, %s71_s17 }
  0x4e   :  { %p677_p7 = scmp.ne.s32.totalorder %s71_s17, %s676_s10  ;;  %p682_p9 = scmp.lt.s32.totalorder %s676_s10, %s676_s10 }
  0x50   :  { %p683_p10 = por %p682_p9, %p681_p8 }
  0x52   :  { %p684_p11 = pnand %p683_p10, %p677_p7 }
  0x54   :  { %687 = shalt.err (!%p684_p11)
}
  0x55   :  { %76 = dma.hbm_to_vmem [thread:$0]  %s973_s4, 256, %s71_s17, [#allocation9], %s747_s22, %s747_s22, %s748_s23  }
  0x56   :  { %732 = dma.done.wait [#allocation3], 128  }
  0x57   :  { %733 = vsyncadd [#allocation3], 4294967168 }
  0x58   :  { %734 = dma.done.wait [#allocation6], 384  }
  0x59   :  { %735 = vsyncadd [#allocation6], 4294966912 }
  0x5a   :  { %736 = dma.done.wait [#allocation9], 512  }
  0x5b   :  { %737 = vsyncadd [#allocation9], 4294966784  ;;  %v105_v0 = vlaneseq  ;;  %v751_v1 = vmov 1966171168   ;;  %v145_v14 = vld [vmem:[#allocation8] sm:$0xf] }
  0x5c   :  { %v103_v2 = vunpack.c.l.s4 %v751_v1  ;;  %v558_v7 = vld.sshfl [vmem:[#allocation2] sm:$0x11 pattern:$0x75316420]  ;;  %v144_v20 = vld [vmem:[#allocation7] sm:$0xf] }
  0x5d   :  { %v106_v3 = vshrl.u32 %v105_v0, 7  ;;  %v559_v9 = vld.sshfl [vmem:[#allocation5] sm:$0x11 pattern:$0x75316420]  ;;  %v101_v10 = vcombine.high %v558_v7, %v558_v7  ;;  %s752_s4 = smov [#allocation11]  }
  0x5e   :  { %v104_v4 = vunpack.c.0.s8 %v103_v2  ;;  %v560_v12 = vld.sshfl [vmem:[#allocation2 + $0x2] sm:$0x11 pattern:$0x75316420]  ;;  %v127_v13 = vcombine.high %v559_v9, %v559_v9  ;;  %v252_v26 = vld [vmem:[#allocation8 + $0x4] sm:$0xf] }
  0x5f   :  { %v866_v6 = vsub.s32 0, %v106_v3  ;;  %v561_v16 = vld.sshfl [vmem:[#allocation5 + $0x2] sm:$0x11 pattern:$0x75316420]  ;;  %v205_v18 = vcombine.high %v560_v12, %v560_v12  ;;  %s528_s3 = sshll.u32 %s752_s4, 4  ;;  %s529_s3 = int_to_ptr.vmem [resolvable:$true] %s528_s3 }
  0x60   :  { %v864_v5 = vsub.s32 %v104_v4, %v106_v3  ;;  %v562_v24 = vld.sshfl [vmem:[#allocation2 + $0x4] sm:$0x11 pattern:$0x75316420]  ;;  %v232_v30 = vcombine.high %v561_v16, %v561_v16  ;;  %v250_v37 = vld [vmem:[#allocation7 + $0x4] sm:$0xf]  ;;  %p693_p13 = scmp.lt.s32.totalorder %s529_s3, %s529_s3 }
  0x61   :  { %v563_v28 = vld.sshfl [vmem:[#allocation5 + $0x4] sm:$0x11 pattern:$0x75316420]  ;;  %v313_v31 = vcombine.high %v562_v24, %v562_v24  ;;  %v360_v46 = vld [vmem:[#allocation8 + $0x8] sm:$0xf] }
  0x62   :  { %v869_v8 = vrot.slane %v558_v7, %v864_v5  ;;  %v134_v11 = vrot.slane %v559_v9, %v864_v5  ;;  %v873_v15 = vrot.slane %v560_v12, %v864_v5  ;;  %v876_v17 = vrot.slane %v101_v10, %v864_v5  ;;  %v564_v36 = vld.sshfl [vmem:[#allocation2 + $0x6] sm:$0x11 pattern:$0x75316420]  ;;  %v468_v50 = vld [vmem:[#allocation8 + $0xc] sm:$0xf] }
  0x63   :  { %v239_v23 = vrot.slane %v561_v16, %v864_v5  ;;  %v141_v25 = vrot.slane %v127_v13, %v864_v5  ;;  %v885_v27 = vrot.slane %v562_v24, %v864_v5  ;;  %v888_v29 = vrot.slane %v205_v18, %v864_v5  ;;  %v565_v40 = vld.sshfl [vmem:[#allocation5 + $0x6] sm:$0x11 pattern:$0x75316420]  ;;  %v358_v55 = vld [vmem:[#allocation7 + $0x8] sm:$0xf] }
  0x64   :  { %v166_v19 = vrot.slane %v869_v8, %v866_v6  ;;  %v147_v21 = vadd.f32 %v134_v11, %v869_v8  ;;  %v178_v22 = vrot.slane %v134_v11, %v866_v6  ;;  %v347_v38 = vrot.slane %v563_v28, %v864_v5  ;;  %v466_v60 = vld [vmem:[#allocation7 + $0xc] sm:$0xf]  ;;  %v146_v10 = vld [vmem:[#allocation10] sm:$0xf]  ;;  %s753_s12 = smov [#allocation12]   ;;  %s688_s15 = scalar_lea.vmem %s529_s3, 128 }
  0x65   :  { %v255_v34 = vadd.f32 %v239_v23, %v873_v15  ;;  %v286_v35 = vrot.slane %v239_v23, %v866_v6  ;;  %v895_v39 = vrot.slane %v564_v36, %v864_v5  ;;  %v148_v41 = vadd.f32 %v141_v25, %v876_v17  ;;  %s540_s13 = sshll.u32 %s753_s12, 4  ;;  %p689_p12 = scmp.ne.s32.totalorder %s529_s3, %s688_s15  ;;  %s541_s13 = int_to_ptr.vmem [resolvable:$true] %s540_s13 }
  0x66   :  { %v154_v32 = vrot.slane %v147_v21, %v866_v6  ;;  %v185_v33 = vmul.f32 %v178_v22, %v145_v14  ;;  %v182_v42 = vrot.slane %v141_v25, %v866_v6  ;;  %v455_v47 = vrot.slane %v565_v40, %v864_v5  ;;  %p694_p0 = scmp.lt.s32.totalorder %s688_s15, %s688_s15 }
  0x67   :  { %v262_v44 = vrot.slane %v255_v34, %v866_v6  ;;  %v293_v45 = vmul.f32 %v286_v35, %v252_v26  ;;  %v363_v48 = vadd.f32 %v347_v38, %v885_v27  ;;  %v394_v49 = vrot.slane %v347_v38, %v866_v6  ;;  %v362_v34 = vld [vmem:[#allocation10 + $0x8] sm:$0xf] }
  0x68   :  { %v161_v43 = vmul.f32 %v154_v32, %v144_v20  ;;  %v158_v51 = vrot.slane %v148_v41, %v866_v6  ;;  %v186_v52 = vmul.f32 %v182_v42, %v145_v14  ;;  %v471_v56 = vadd.f32 %v455_v47, %v895_v39  ;;  %p695_p1 = por %p694_p0, %p693_p13 }
  0x69   :  { %v269_v54 = vmul.f32 %v262_v44, %v250_v37  ;;  %v502_v57 = vrot.slane %v455_v47, %v866_v6  ;;  %v370_v58 = vrot.slane %v363_v48, %v866_v6  ;;  %v401_v59 = vmul.f32 %v394_v49, %v360_v46 }
  0x6a   :  { %v187_v53 = vsub.f32 %v161_v43, %v185_v33  ;;  %v907_v61 = vmul.f32 %v158_v51, %v144_v20  ;;  %v246_v62 = vrot.slane %v232_v30, %v864_v5  ;;  %v478_v0 = vrot.slane %v471_v56, %v866_v6  ;;  %p696_p2 = pnand %p695_p1, %p689_p12 }
  0x6b   :  { %v295_v63 = vsub.f32 %v269_v54, %v293_v45  ;;  %v509_v1 = vmul.f32 %v502_v57, %v468_v50  ;;  %v327_v2 = vrot.slane %v313_v31, %v864_v5  ;;  %v377_v3 = vmul.f32 %v370_v58, %v358_v55  ;;  %v470_v45 = vld [vmem:[#allocation10 + $0xc] sm:$0xf] }
  0x6c   :  { %v188_v4 = vsub.f32 %v907_v61, %v186_v52  ;;  %v256_v7 = vadd.f32 %v246_v62, %v888_v29  ;;  %v290_v9 = vrot.slane %v246_v62, %v866_v6  ;;  %v485_v12 = vmul.f32 %v478_v0, %v466_v60 }
  0x6d   :  { %v297_v11 = vadd.f32 %v295_v63, %v187_v53  ;;  %v340_v13 = vcombine.high %v563_v28, %v563_v28  ;;  %v421_v14 = vcombine.high %v564_v36, %v564_v36  ;;  %v403_v16 = vsub.f32 %v377_v3, %v401_v59  ;;  %v254_v28 = vld [vmem:[#allocation10 + $0x4] sm:$0xf] }
  0x6e   :  { %v266_v18 = vrot.slane %v256_v7, %v866_v6  ;;  %v294_v20 = vmul.f32 %v290_v9, %v252_v26  ;;  %v448_v21 = vcombine.high %v565_v40, %v565_v40  ;;  %v511_v22 = vsub.f32 %v485_v12, %v509_v1 }
  0x6f   :  { %v354_v23 = vrot.slane %v340_v13, %v864_v5  ;;  %v435_v24 = vrot.slane %v421_v14, %v864_v5  ;;  %v173_v25 = vmul.f32 %v166_v19, %v146_v10  ;;  %v405_v30 = vadd.f32 %v403_v16, %v297_v11 }
  0x70   :  { %v270_v31 = vmul.f32 %v266_v18, %v250_v37  ;;  %v462_v32 = vrot.slane %v448_v21, %v864_v5  ;;  %v274_v33 = vrot.slane %v873_v15, %v866_v6  ;;  %v382_v38 = vrot.slane %v885_v27, %v866_v6 }
  0x71   :  { %v364_v26 = vadd.f32 %v354_v23, %v327_v2  ;;  %v398_v35 = vrot.slane %v354_v23, %v866_v6  ;;  %v191_v36 = vadd.f32 %v173_v25, %v161_v43  ;;  %v513_v40 = vadd.f32 %v511_v22, %v405_v30 }
  0x72   :  { %v296_v41 = vsub.f32 %v270_v31, %v294_v20  ;;  %v472_v8 = vadd.f32 %v462_v32, %v435_v24  ;;  %v506_v19 = vrot.slane %v462_v32, %v866_v6  ;;  %v281_v42 = vmul.f32 %v274_v33, %v254_v28 }
  0x73   :  { %v374_v37 = vrot.slane %v364_v26, %v866_v6  ;;  %v402_v5 = vmul.f32 %v398_v35, %v360_v46  ;;  %v389_v44 = vmul.f32 %v382_v38, %v362_v34  ;;  %519 = vst [vmem:[#allocation11] sm:$0xf] %v513_v40  ;;  %v490_v43 = vrot.slane %v895_v39, %v866_v6 }
  0x74   :  { %v298_v15 = vadd.f32 %v296_v41, %v188_v4  ;;  %v482_v47 = vrot.slane %v472_v8, %v866_v6  ;;  %v510_v48 = vmul.f32 %v506_v19, %v468_v50  ;;  %v299_v49 = vadd.f32 %v281_v42, %v269_v54 }
  0x75   :  { %v378_v27 = vmul.f32 %v374_v37, %v358_v55  ;;  %v407_v51 = vadd.f32 %v389_v44, %v377_v3  ;;  %v170_v52 = vrot.slane %v876_v17, %v866_v6  ;;  %v497_v56 = vmul.f32 %v490_v43, %v470_v45 }
  0x76   :  { %v486_v53 = vmul.f32 %v482_v47, %v466_v60  ;;  %v278_v46 = vrot.slane %v888_v29, %v866_v6  ;;  %v386_v57 = vrot.slane %v327_v2, %v866_v6  ;;  %v301_v59 = vadd.f32 %v299_v49, %v191_v36 }
  0x77   :  { %v404_v58 = vsub.f32 %v378_v27, %v402_v5  ;;  %v174_v62 = vmul.f32 %v170_v52, %v146_v10  ;;  %v494_v50 = vrot.slane %v435_v24, %v866_v6  ;;  %v515_v39 = vadd.f32 %v497_v56, %v485_v12 }
  0x78   :  { %v512_v63 = vsub.f32 %v486_v53, %v510_v48  ;;  %v282_v55 = vmul.f32 %v278_v46, %v254_v28  ;;  %v390_v54 = vmul.f32 %v386_v57, %v362_v34  ;;  %v409_v17 = vadd.f32 %v407_v51, %v301_v59 }
  0x79   :  { %v406_v0 = vadd.f32 %v404_v58, %v298_v15  ;;  %v192_v60 = vadd.f32 %v174_v62, %v907_v61  ;;  %v498_v1 = vmul.f32 %v494_v50, %v470_v45 }
  0x7a   :  { %v300_v3 = vadd.f32 %v282_v55, %v270_v31  ;;  %v408_v29 = vadd.f32 %v390_v54, %v378_v27  ;;  %v517_v2 = vadd.f32 %v515_v39, %v409_v17 }
  0x7b   :  { %v514_v4 = vadd.f32 %v512_v63, %v406_v0  ;;  %v516_v9 = vadd.f32 %v498_v1, %v486_v53 }
  0x7c   :  { %v302_v7 = vadd.f32 %v300_v3, %v192_v60  ;;  %521 = vst [vmem:[#allocation12] sm:$0xf] %v517_v2 }
  0x7d   :  { %520 = vst [vmem:[#allocation11 + $0x4] sm:$0xf] %v514_v4 }
  0x7e   :  { %v410_v6 = vadd.f32 %v408_v29, %v302_v7 }
  0x7f   :  { %699 = shalt.err (!%p696_p2)
}
  0x80   :  { %s700_s18 = scalar_lea.hbm %s974_s5, 128 }
  0x81   :  { %p701_p3 = scmp.ne.s32.totalorder %s974_s5, %s700_s18  ;;  %p704_p4 = scmp.lt.u32.totalorder %s700_s18, %s974_s5 }
  0x83   :  { %p706_p5 = pnand %p704_p4, %p701_p3 }
  0x85   :  { %709 = shalt.err (!%p706_p5)
}
  0x86   :  { %534 = dma.vmem_to_hbm [thread:$0]  %s529_s3, 128, %s974_s5, [#allocation4], %s747_s22, %s747_s22, %s748_s23   ;;  %v518_v61 = vadd.f32 %v516_v9, %v410_v6 }
  0x87   :  { %s710_s0 = scalar_lea.vmem %s541_s13, 128  ;;  %p715_p7 = scmp.lt.s32.totalorder %s541_s13, %s541_s13 }
  0x88   :  { %522 = vst [vmem:[#allocation12 + $0x4] sm:$0xf] %v518_v61  ;;  %p711_p6 = scmp.ne.s32.totalorder %s541_s13, %s710_s0  ;;  %p716_p8 = scmp.lt.s32.totalorder %s710_s0, %s710_s0 }
  0x8a   :  { %p717_p9 = por %p716_p8, %p715_p7 }
  0x8c   :  { %p718_p10 = pnand %p717_p9, %p711_p6 }
  0x8e   :  { %721 = shalt.err (!%p718_p10)
}
  0x8f   :  { %s722_s14 = scalar_lea.hbm %s975_s6, 128 }
  0x90   :  { %p723_p11 = scmp.ne.s32.totalorder %s975_s6, %s722_s14  ;;  %p726_p12 = scmp.lt.u32.totalorder %s722_s14, %s975_s6 }
  0x92   :  { %p728_p13 = pnand %p726_p12, %p723_p11 }
  0x94   :  { %731 = shalt.err (!%p728_p13)
}
  0x95   :  { %546 = dma.vmem_to_hbm [thread:$0]  %s541_s13, 128, %s975_s6, [#allocation13], %s747_s22, %s747_s22, %s748_s23  }
  0x96   :  { %738 = dma.done.wait [#allocation4], 128  }
  0x97   :  { %739 = vsyncadd [#allocation4], 4294967168 }
  0x98   :  { %740 = dma.done.wait [#allocation13], 128  }
  0x99   :  { %741 = vsyncadd [#allocation13], 4294967168 }
  0x9a   :  { %553 = vsyncpa [#allocation3], 1 }
  0x9b   :  { %554 = vsyncpa [#allocation6], 1 }
  0x9c   :  { %555 = vsyncpa [#allocation9], 1 }
  0x9d   :  { %556 = vsyncpa [#allocation4], 1 }
  0x9e   :  { %557 = vsyncpa [#allocation13], 1 }

</bundles_post_ra>
